<compile_context>
chip_gen: v7x
topology: tpu7x:2x2x1
jax: 0.10.0
libtpu: 0.0.40
codegen_flags: <defaults>
</compile_context>

<pallas_src>
import jax
import jax.numpy as jnp
from jax.experimental import pallas as pl
from jax.experimental.pallas import tpu as pltpu


def _round_up(v: int, m: int) -> int:
    return (v + m - 1) // m * m


def _lip_linear_kernel(scale_ref, x_ref, w_ref, b_ref, o_ref, acc_ref):
    # scale_ref: (1,) f32 in SMEM  -> lip_const / (||W||_2 + 1e-6)  (or 1.0)
    # x_ref:     (tm, tk) VMEM     -> input tile
    # w_ref:     (tk, tn) VMEM     -> W^T tile (MXU-native K-major feed)
    # b_ref:     (1, tn)  VMEM     -> bias tile (same block across K / M; not re-fetched)
    # o_ref:     (tm, tn)          -> output tile
    # acc_ref:   (tm, tn) f32 VMEM scratch, persists across the K axis
    k = pl.program_id(2)

    @pl.when(k == 0)
    def _init():
        acc_ref[...] = jnp.zeros_like(acc_ref)

    acc_ref[...] += jnp.dot(
        x_ref[...], w_ref[...], preferred_element_type=jnp.float32
    )

    @pl.when(k == pl.num_programs(2) - 1)
    def _epilogue():
        # Bias add + Lipschitz rescale applied exactly once per output tile,
        # in f32, on the accumulator (cheap VPU work hidden under the
        # MXU-bound K loop; f32 keeps v5e's non-bf16 VPU happy).
        out = acc_ref[...] + b_ref[...].astype(jnp.float32)
        o_ref[...] = (out * scale_ref[0]).astype(o_ref.dtype)


def _spectral_norm_power_iteration(weight, num_iters=500):
    """Largest singular value of `weight` via power iteration.

    Replaces the SVD behind torch.linalg.matrix_norm(W, ord=2) with a
    matmul-only (MXU-friendly) loop. In a real model this scalar is a
    function of the weights only and would be cached outside the hot path.
    """
    w = weight.astype(jnp.float32)
    d_in = w.shape[1]
    v = jax.random.normal(jax.random.PRNGKey(0), (d_in,), jnp.float32)
    v = v / (jnp.linalg.norm(v) + 1e-12)

    def body(_, v):
        u = w @ v
        u = u / (jnp.linalg.norm(u) + 1e-12)
        v = w.T @ u
        return v / (jnp.linalg.norm(v) + 1e-12)

    v = jax.lax.fori_loop(0, num_iters, body, v)
    return jnp.linalg.norm(w @ v)


def lip_linear(x, weight, bias, lip_const=None, *,
               tm=256, tn=256, tk=512, n_power_iter=500):
    """Pallas implementation of LipLinear.forward.

    x: (..., D_in); weight: (D_out, D_in) [torch layout]; bias: (D_out,).
    """
    orig_shape = x.shape
    d_in = orig_shape[-1]
    d_out, d_in_w = weight.shape
    assert d_in_w == d_in, (weight.shape, d_in)

    x2 = x.reshape(-1, d_in)
    m = x2.shape[0]

    # ---- Lipschitz scale (scalar, passed through SMEM) ---------------------
    if lip_const is not None:
        sigma = _spectral_norm_power_iteration(weight, n_power_iter)
        scale = jnp.float32(lip_const) / (sigma + jnp.float32(1e-6))
    else:
        scale = jnp.float32(1.0)
    scale = scale.reshape(1).astype(jnp.float32)

    # ---- MXU-native weight layout + padding to tile multiples --------------
    wt = weight.T  # (D_in, D_out), transposed once outside the kernel.

    tm = min(tm, _round_up(m, 8))        # sublane-aligned M tile
    tn = min(tn, _round_up(d_out, 128))  # lane-dense N tile (unmasked vst)
    tk = min(tk, _round_up(d_in, 128))   # lane-dense K tile

    m_p = _round_up(m, tm)
    n_p = _round_up(d_out, tn)
    k_p = _round_up(d_in, tk)

    x_p = x2 if (m_p == m and k_p == d_in) else jnp.pad(
        x2, ((0, m_p - m), (0, k_p - d_in)))
    w_p = wt if (k_p == d_in and n_p == d_out) else jnp.pad(
        wt, ((0, k_p - d_in), (0, n_p - d_out)))
    b_p = bias.reshape(1, d_out)
    if n_p != d_out:
        b_p = jnp.pad(b_p, ((0, 0), (0, n_p - d_out)))

    grid = (m_p // tm, n_p // tn, k_p // tk)
    itemsize = jnp.dtype(x2.dtype).itemsize

    out_p = pl.pallas_call(
        _lip_linear_kernel,
        out_shape=jax.ShapeDtypeStruct((m_p, n_p), x.dtype),
        grid_spec=pltpu.PrefetchScalarGridSpec(
            num_scalar_prefetch=0,
            grid=grid,
            in_specs=[
                pl.BlockSpec(memory_space=pltpu.MemorySpace.SMEM),   # scale (1,)
                pl.BlockSpec((tm, tk), lambda i, j, k: (i, k)),      # x tile
                pl.BlockSpec((tk, tn), lambda i, j, k: (k, j)),      # W^T tile
                pl.BlockSpec((1, tn), lambda i, j, k: (0, j)),       # bias tile
            ],
            out_specs=pl.BlockSpec((tm, tn), lambda i, j, k: (i, j)),
            scratch_shapes=[pltpu.VMEM((tm, tn), jnp.float32)],
        ),
        compiler_params=pltpu.CompilerParams(
            dimension_semantics=("parallel", "parallel", "arbitrary"),
            vmem_limit_bytes=48 * 1024 * 1024,
        ),
        cost_estimate=pl.CostEstimate(
            flops=2 * m_p * k_p * n_p,
            transcendentals=0,
            bytes_accessed=(m_p * k_p + k_p * n_p + n_p + m_p * n_p) * itemsize,
        ),
    )(scale, x_p, w_p, b_p)

    out = out_p[:m, :d_out]
    return out.reshape(*orig_shape[:-1], d_out)


def _reference(x, weight, bias, lip_const):
    """Exact reference matching the PyTorch module (SVD spectral norm)."""
    out = jnp.einsum("...i,oi->...o", x, weight) + bias
    if lip_const is not None:
        mat_norm = jnp.linalg.norm(weight, ord=2)
        out = lip_const / (mat_norm + 1e-6) * out
    return out


if __name__ == "__main__":
    key = jax.random.PRNGKey(0)
    kx, kw, kb = jax.random.split(key, 3)

    input_dim, output_dim = 32, 16
    lip_const = 0.9

    # Deterministic PyTorch-Linear-style init: U(-1/sqrt(in), 1/sqrt(in)).
    bound = 1.0 / (input_dim ** 0.5)
    weight = jax.random.uniform(kw, (output_dim, input_dim), jnp.float32, -bound, bound)
    bias = jax.random.uniform(kb, (output_dim,), jnp.float32, -bound, bound)

    # x: (batch=2, seq=4, input_dim=32)
    x = jax.random.normal(kx, (2, 4, input_dim), jnp.float32)

    out = jax.block_until_ready(lip_linear(x, weight, bias, lip_const))
    assert out.shape == (2, 4, output_dim), out.shape

    # (a) Tight kernel-exactness check against a reference that uses the SAME
    #     power-iteration norm (isolates the matmul + bias + scale path).
    sigma_pi = _spectral_norm_power_iteration(weight, 500)
    ref_same = (lip_const / (sigma_pi + 1e-6)) * (
        jnp.einsum("...i,oi->...o", x, weight) + bias)
    assert jnp.allclose(out, ref_same, atol=1e-5, rtol=1e-5), \
        float(jnp.max(jnp.abs(out - ref_same)))

    # (b) End-to-end semantic check against the exact (SVD) spectral norm;
    #     tolerance covers residual power-iteration error.
    ref_exact = _reference(x, weight, bias, lip_const)
    assert jnp.allclose(out, ref_exact, atol=1e-2, rtol=1e-2), \
        float(jnp.max(jnp.abs(out - ref_exact)))

    # (c) lip_const=None path (pure linear) — exact.
    out_none = jax.block_until_ready(lip_linear(x, weight, bias, None))
    ref_none = _reference(x, weight, bias, None)
    assert jnp.allclose(out_none, ref_none, atol=1e-5, rtol=1e-5), \
        float(jnp.max(jnp.abs(out_none - ref_none)))

    print("KERNEL_OK")
</pallas_src>

<mosaic_0001>
module attributes {stable_mosaic.version = 11 : i64} {
  func.func @_lip_linear_kernel(%arg0: i32, %arg1: i32, %arg2: i32, %arg3: memref<1xf32, #tpu.memory_space<smem>>, %arg4: memref<8x128xf32, #tpu.memory_space<vmem>>, %arg5: memref<128x128xf32, #tpu.memory_space<vmem>>, %arg6: memref<1x128xf32, #tpu.memory_space<vmem>>, %arg7: memref<8x128xf32, #tpu.memory_space<vmem>>, %arg8: memref<8x128xf32, #tpu.memory_space<vmem>>) attributes {dimension_semantics = [#tpu.dimension_semantics<parallel>, #tpu.dimension_semantics<parallel>, #tpu.dimension_semantics<arbitrary>], iteration_bounds = array<i64: 1, 1, 1>, scalar_prefetch = 0 : i64, scratch_operands = 1 : i64, tpu.core_type = #tpu.core_type<tc>, window_params = [{transform_indices = @transform_0, window_bounds = array<i64: 1>}, {transform_indices = @transform_1, window_bounds = array<i64: 8, 128>}, {transform_indices = @transform_2, window_bounds = array<i64: 128, 128>}, {transform_indices = @transform_3, window_bounds = array<i64: 1, 128>}, {transform_indices = @transform_4, window_bounds = array<i64: 8, 128>}]} {
    %c0_i32 = arith.constant 0 : i32
    %0 = arith.cmpi eq, %arg2, %c0_i32 : i32
    %1 = arith.extui %0 : i1 to i32
    %c0_i32_0 = arith.constant 0 : i32
    %2 = arith.cmpi ne, %1, %c0_i32_0 : i32
    scf.if %2 {
      %cst_10 = arith.constant 0.000000e+00 : f32
      %12 = vector.broadcast %cst_10 : f32 to vector<8x128xf32>
      %c0_11 = arith.constant 0 : index
      %c0_12 = arith.constant 0 : index
      %13 = vector.load %arg8[%c0_11, %c0_12] : memref<8x128xf32, #tpu.memory_space<vmem>>, vector<8x128xf32>
      tpu.vector_store %arg8[%c0_11, %c0_12], %12 {strides = array<i32>} : memref<8x128xf32, #tpu.memory_space<vmem>>, vector<8x128xf32>,
    } else {
    }
    %c0 = arith.constant 0 : index
    %c0_1 = arith.constant 0 : index
    %3 = vector.load %arg8[%c0, %c0_1] : memref<8x128xf32, #tpu.memory_space<vmem>>, vector<8x128xf32>
    %c0_2 = arith.constant 0 : index
    %c0_3 = arith.constant 0 : index
    %4 = vector.load %arg4[%c0_2, %c0_3] : memref<8x128xf32, #tpu.memory_space<vmem>>, vector<8x128xf32>
    %c0_4 = arith.constant 0 : index
    %c0_5 = arith.constant 0 : index
    %5 = vector.load %arg5[%c0_4, %c0_5] : memref<128x128xf32, #tpu.memory_space<vmem>>, vector<128x128xf32>
    %cst = arith.constant dense<0.000000e+00> : vector<8x128xf32>
    %6 = tpu.matmul %4, %5, %cst {dimension_numbers = #tpu.dot_dimension_numbers<[1], [0], [0], [1], [0, 0, 1, 1], [], []>} : vector<8x128xf32>, vector<128x128xf32>, vector<8x128xf32> -> vector<8x128xf32>
    %7 = arith.addf %3, %6 : vector<8x128xf32>
    %c0_6 = arith.constant 0 : index
    %c0_7 = arith.constant 0 : index
    %8 = vector.load %arg8[%c0_6, %c0_7] : memref<8x128xf32, #tpu.memory_space<vmem>>, vector<8x128xf32>
    tpu.vector_store %arg8[%c0_6, %c0_7], %7 {strides = array<i32>} : memref<8x128xf32, #tpu.memory_space<vmem>>, vector<8x128xf32>,
    %c0_i32_8 = arith.constant 0 : i32
    %9 = arith.cmpi eq, %arg2, %c0_i32_8 : i32
    %10 = arith.extui %9 : i1 to i32
    %c0_i32_9 = arith.constant 0 : i32
    %11 = arith.cmpi ne, %10, %c0_i32_9 : i32
    scf.if %11 {
      %c0_10 = arith.constant 0 : index
      %c0_11 = arith.constant 0 : index
      %12 = vector.load %arg8[%c0_10, %c0_11] : memref<8x128xf32, #tpu.memory_space<vmem>>, vector<8x128xf32>
      %c0_12 = arith.constant 0 : index
      %c0_13 = arith.constant 0 : index
      %13 = vector.load %arg6[%c0_12, %c0_13] : memref<1x128xf32, #tpu.memory_space<vmem>>, vector<1x128xf32>
      %14 = vector.broadcast %13 : vector<1x128xf32> to vector<8x128xf32>
      %15 = arith.addf %12, %14 : vector<8x128xf32>
      %c0_14 = arith.constant 0 : index
      %16 = memref.load %arg3[%c0_14] : memref<1xf32, #tpu.memory_space<smem>>
      %17 = vector.broadcast %16 : f32 to vector<8x128xf32>
      %18 = arith.mulf %15, %17 : vector<8x128xf32>
      %c0_15 = arith.constant 0 : index
      %c0_16 = arith.constant 0 : index
      %19 = vector.load %arg7[%c0_15, %c0_16] : memref<8x128xf32, #tpu.memory_space<vmem>>, vector<8x128xf32>
      tpu.vector_store %arg7[%c0_15, %c0_16], %18 {strides = array<i32>} : memref<8x128xf32, #tpu.memory_space<vmem>>, vector<8x128xf32>,
    } else {
    }
    return
  }
  func.func @transform_0(%arg0: i32, %arg1: i32, %arg2: i32) -> i32 {
    %c0_i32 = arith.constant 0 : i32
    %c0_i32_0 = arith.constant 0 : i32
    return %c0_i32 : i32
  }
  func.func @transform_1(%arg0: i32, %arg1: i32, %arg2: i32) -> (i32, i32) {
    %c0_i32 = arith.constant 0 : i32
    return %arg0, %arg2 : i32, i32
  }
  func.func @transform_2(%arg0: i32, %arg1: i32, %arg2: i32) -> (i32, i32) {
    %c0_i32 = arith.constant 0 : i32
    return %arg2, %arg1 : i32, i32
  }
  func.func @transform_3(%arg0: i32, %arg1: i32, %arg2: i32) -> (i32, i32) {
    %c0_i32 = arith.constant 0 : i32
    %c0_i32_0 = arith.constant 0 : i32
    return %c0_i32, %arg1 : i32, i32
  }
  func.func @transform_4(%arg0: i32, %arg1: i32, %arg2: i32) -> (i32, i32) {
    %c0_i32 = arith.constant 0 : i32
    return %arg0, %arg1 : i32, i32
  }
}

</mosaic_0001>

<bundles_post_ra>
// kernel: tpu_custom_call.1
= control target key start
LH: loop header
LB: loop body
LE: loop exit
PB: predicated region body
PF: predicated region fallthrough
CT: control target
= control target key end

     0   :  { %10 = vsyncpa [#allocation5], 0  ;;  %s411_s0 = inlined_call_operand.<no memory space> [shape: f32[1], index: 0, kind: input, shape index: {}]   ;;  %s412_s1 = inlined_call_operand.hbm [shape: f32[8,128], index: 1, kind: input, shape index: {}]   ;;  %s413_s2 = inlined_call_operand.hbm [shape: f32[128,128], index: 2, kind: input, shape index: {}]   ;;  %s414_s3 = inlined_call_operand.vmem [shape: f32[1,128], index: 3, kind: input, shape index: {}]   ;;  %s415_s4 = inlined_call_operand.hbm [shape: f32[8,128], index: 4, kind: output, shape index: {}]  }
   0x1   :  { %11 = vsyncpa [#allocation8], 0 }
   0x2   :  { %12 = vsyncpa [#allocation6], 0  ;;  %s329_s15 = smov [#allocation4]   ;;  %s330_s17 = smov [#allocation7]  }
   0x3   :  { %s21_s16 = sshll.u32 %s329_s15, 4  ;;  %s30_s18 = sshll.u32 %s330_s17, 4  ;;  %s22_s16 = int_to_ptr.vmem [resolvable:$true] %s21_s16  ;;  %s362_s18 = int_to_ptr.vmem [resolvable:$true] %s30_s18 }
   0x4   :  { %s257_s21 = scalar_lea.hbm %s412_s1, 128 }
   0x5   :  { %p258_p0 = scmp.ne.s32.totalorder %s412_s1, %s257_s21  ;;  %p261_p1 = scmp.lt.u32.totalorder %s257_s21, %s412_s1 }
   0x7   :  { %p263_p2 = pnand %p261_p1, %p258_p0 }
   0x9   :  { %266 = shalt.err (!%p263_p2)
}
   0xa   :  { %s267_s26 = scalar_lea.vmem %s22_s16, 128  ;;  %p272_p4 = scmp.lt.s32.totalorder %s22_s16, %s22_s16 }
   0xb   :  { %p268_p3 = scmp.ne.s32.totalorder %s22_s16, %s267_s26  ;;  %p273_p5 = scmp.lt.s32.totalorder %s267_s26, %s267_s26 }
   0xd   :  { %p274_p6 = por %p273_p5, %p272_p4 }
   0xf   :  { %p275_p7 = pnand %p274_p6, %p268_p3 }
  0x11   :  { %278 = shalt.err (!%p275_p7)
}
  0x12   :  { %24 = dma.hbm_to_vmem [thread:$0]  %s412_s1, 128, %s22_s16, [#allocation5]  }
  0x13   :  { %s279_s5 = scalar_lea.hbm %s413_s2, 2048 }
  0x14   :  { %p280_p8 = scmp.ne.s32.totalorder %s413_s2, %s279_s5  ;;  %p283_p9 = scmp.lt.u32.totalorder %s279_s5, %s413_s2 }
  0x16   :  { %p285_p10 = pnand %p283_p9, %p280_p8 }
  0x18   :  { %288 = shalt.err (!%p285_p10)
}
  0x19   :  { %s289_s10 = scalar_lea.vmem %s362_s18, 2048  ;;  %p294_p12 = scmp.lt.s32.totalorder %s362_s18, %s362_s18 }
  0x1a   :  { %p290_p11 = scmp.ne.s32.totalorder %s362_s18, %s289_s10  ;;  %p295_p13 = scmp.lt.s32.totalorder %s289_s10, %s289_s10 }
  0x1c   :  { %p296_p0 = por %p295_p13, %p294_p12 }
  0x1e   :  { %p297_p1 = pnand %p296_p0, %p290_p11 }
  0x20   :  { %300 = shalt.err (!%p297_p1)
}
  0x21   :  { %s331_s1 = smov 128   ;;  %s332_s11 = smov 8  }
  0x22   :  { %36 = dma.hbm_to_vmem [thread:$0]  %s413_s2, 2048, %s362_s18, [#allocation8], %s331_s1, %s331_s1, %s332_s11  }
  0x23   :  { %323 = dma.done.wait [#allocation5], 128  }
  0x24   :  { %324 = vsyncadd [#allocation5], 4294967168 }
  0x25   :  { %325 = dma.done.wait [#allocation8], 2048  }
  0x26   :  { %326 = vsyncadd [#allocation8], 4294965248  ;;  %v333_v0 = vmov 0.0|0.0   ;;  %vm334_vm0 = vmmov 0   ;;  %v335_v1 = vmov 0.0   ;;  %v52_v2 = vld [vmem:[#allocation7] sm:$0xff]  ;;  %v153_v29 = vstv %s411_s0 }
  0x27   :  { %225 = vmatprep.subr.bf16.mxu0 %v333_v0  ;;  %222 = vmatprep.mubr.msk.f32.mxu0 %vm334_vm0, %v335_v1  ;;  %v53_v3 = vld [vmem:[#allocation7 + $0x8] sm:$0xff]  ;;  %v54_v4 = vld [vmem:[#allocation7 + $0x10] sm:$0xff]  ;;  %v55_v6 = vld [vmem:[#allocation7 + $0x18] sm:$0xff]  ;;  %s336_s17 = smov [#allocation9]  }
  0x28   :  { %v226_v5 = vpack.c.bf16 %v53_v3, %v52_v2  ;;  %v229_v7 = vpack.c.bf16 %v55_v6, %v54_v4  ;;  %v56_v8 = vld [vmem:[#allocation7 + $0x20] sm:$0xff]  ;;  %v57_v9 = vld [vmem:[#allocation7 + $0x28] sm:$0xff]  ;;  %v58_v11 = vld [vmem:[#allocation7 + $0x30] sm:$0xff]  ;;  %s162_s18 = sshll.u32 %s336_s17, 4  ;;  %s163_s18 = int_to_ptr.vmem [resolvable:$true] %s162_s18 }
  0x29   :  { %v232_v10 = vpack.c.bf16 %v57_v9, %v56_v8  ;;  %v59_v12 = vld [vmem:[#allocation7 + $0x38] sm:$0xff]  ;;  %v60_v14 = vld [vmem:[#allocation7 + $0x40] sm:$0xff]  ;;  %v61_v15 = vld [vmem:[#allocation7 + $0x48] sm:$0xff]  ;;  %s301_s19 = scalar_lea.vmem %s163_s18, 128  ;;  %p306_p3 = scmp.lt.s32.totalorder %s163_s18, %s163_s18 }
  0x2a   :  { %227 = vmatpush3.bf16.msra.mxu0 %v226_v5  ;;  %v235_v13 = vpack.c.bf16 %v59_v12, %v58_v11  ;;  %v238_v16 = vpack.c.bf16 %v61_v15, %v60_v14  ;;  %v62_v17 = vld [vmem:[#allocation7 + $0x50] sm:$0xff]  ;;  %v63_v18 = vld [vmem:[#allocation7 + $0x58] sm:$0xff]  ;;  %v64_v20 = vld [vmem:[#allocation7 + $0x60] sm:$0xff]  ;;  %p302_p2 = scmp.ne.s32.totalorder %s163_s18, %s301_s19  ;;  %p307_p4 = scmp.lt.s32.totalorder %s301_s19, %s301_s19 }
  0x2b   :  { %228 = vmatprep.subr.bf16.mxu0 %v333_v0  ;;  %v241_v19 = vpack.c.bf16 %v63_v18, %v62_v17  ;;  %v65_v21 = vld [vmem:[#allocation7 + $0x68] sm:$0xff]  ;;  %v66_v23 = vld [vmem:[#allocation7 + $0x70] sm:$0xff]  ;;  %v67_v24 = vld [vmem:[#allocation7 + $0x78] sm:$0xff] }
  0x2c   :  { %v244_v22 = vpack.c.bf16 %v65_v21, %v64_v20  ;;  %v247_v25 = vpack.c.bf16 %v67_v24, %v66_v23  ;;  %v51_v26 = vld [vmem:[#allocation4] sm:$0xff]  ;;  %p308_p5 = por %p307_p4, %p306_p3 }
  0x2d   :  { %v172_v27 = vld [vmem:[%s414_s3] ss:$0 sm:$0xff] }
  0x2e   :  { %230 = vmatpush3.bf16.msra.mxu0 %v229_v7  ;;  %p309_p6 = pnand %p308_p5, %p302_p2 }
  0x2f   :  { %231 = vmatprep.subr.bf16.mxu0 %v333_v0 }
  0x32   :  { %233 = vmatpush3.bf16.msra.mxu0 %v232_v10 }
  0x33   :  { %234 = vmatprep.subr.bf16.mxu0 %v333_v0 }
  0x36   :  { %236 = vmatpush3.bf16.msra.mxu0 %v235_v13 }
  0x37   :  { %237 = vmatprep.subr.bf16.mxu0 %v333_v0 }
  0x3a   :  { %239 = vmatpush3.bf16.msra.mxu0 %v238_v16 }
  0x3b   :  { %240 = vmatprep.subr.bf16.mxu0 %v333_v0 }
  0x3e   :  { %242 = vmatpush3.bf16.msra.mxu0 %v241_v19 }
  0x3f   :  { %243 = vmatprep.subr.bf16.mxu0 %v333_v0 }
  0x42   :  { %245 = vmatpush3.bf16.msra.mxu0 %v244_v22 }
  0x43   :  { %246 = vmatprep.subr.bf16.mxu0 %v333_v0 }
  0x46   :  { %248 = vmatpush3.bf16.msra.mxu0 %v247_v25 }
  0x49   :  { %223 = vmatmul.mubr.f32.vlgmr.msra.gmra.mrb[0].mxu0 %v51_v26 }
 0x11c   :  { %v134_v28 = vpop.f32.mrb[0].mxu0 }
 0x11d   :  { %v151_v30 = vadd.f32 %v172_v27, %v134_v28  ;;  %v224_v31 = vpop.f32.mrb[1].mxu0 }
 0x11f   :  { %v154_v32 = vmul.f32 %v153_v29, %v151_v30 }
 0x121   :  { %155 = vst [vmem:[#allocation9] sm:$0xff] %v154_v32 }
 0x122   :  { %312 = shalt.err (!%p309_p6)
}
 0x123   :  { %s313_s21 = scalar_lea.hbm %s415_s4, 128 }
 0x124   :  { %p314_p7 = scmp.ne.s32.totalorder %s415_s4, %s313_s21  ;;  %p317_p8 = scmp.lt.u32.totalorder %s313_s21, %s415_s4 }
 0x126   :  { %p319_p9 = pnand %p317_p8, %p314_p7 }
 0x128   :  { %322 = shalt.err (!%p319_p9)
}
 0x129   :  { %165 = dma.vmem_to_hbm [thread:$0]  %s163_s18, 128, %s415_s4, [#allocation6]  }
 0x12a   :  { %327 = dma.done.wait [#allocation6], 128  }
 0x12b   :  { %328 = vsyncadd [#allocation6], 4294967168 }
 0x12c   :  { %169 = vsyncpa [#allocation5], 1 }
 0x12d   :  { %170 = vsyncpa [#allocation8], 1 }
 0x12e   :  { %171 = vsyncpa [#allocation6], 1 }

</bundles_post_ra>
